<compile_context>
chip_gen: v5e
topology: v5e:2x2
jax: 0.10.0
libtpu: 0.0.40
codegen_flags: <defaults>
</compile_context>

<pallas_src>
import functools

import jax
import jax.numpy as jnp
from jax.experimental import pallas as pl
from jax.experimental.pallas import tpu as pltpu

# --------------------------------------------------------------------------
# Pallas kernels: tiled matmul + folded-BN bias + optional ReLU / residual
# --------------------------------------------------------------------------

_LANE = 128                      # lane width: K / N alignment
_SUB = 16                        # bf16 sublane pack: M tile granularity
_TM = 256                        # M tile cap
_TN = 128                        # N tile (>=2 parallel blocks when Cout>=256)
_TK_MAX = 8192                   # single-K-step threshold (resnet34 K<=4608)
_VMEM_LIMIT = 32 * 1024 * 1024   # raises v5e default, safe on v7x 64 MiB


def _round_up(n, m):
    return ((n + m - 1) // m) * m


def _mm_kernel_1k(a_ref, w_ref, b_ref, o_ref, *, relu):
    # single K step: no scratch accumulator; bias/ReLU fused; bf16 store
    out = jnp.dot(a_ref[...], w_ref[...], preferred_element_type=jnp.float32)
    out = out + b_ref[...]
    if relu:
        out = jnp.maximum(out, 0.0)
    o_ref[...] = out.astype(o_ref.dtype)


def _mm_res_kernel_1k(a_ref, w_ref, b_ref, id_ref, o_ref):
    # conv2 of a resnet block: relu(a@w + bias + identity), fused residual join
    out = jnp.dot(a_ref[...], w_ref[...], preferred_element_type=jnp.float32)
    out = out + b_ref[...] + id_ref[...].astype(jnp.float32)
    o_ref[...] = jnp.maximum(out, 0.0).astype(o_ref.dtype)


def _mm_kernel(a_ref, w_ref, b_ref, o_ref, acc_ref, *, relu):
    # multi-K fallback (not hit for resnet34 at these shapes)
    k = pl.program_id(2)
    prod = jnp.dot(a_ref[...], w_ref[...], preferred_element_type=jnp.float32)

    @pl.when(k == 0)
    def _():
        acc_ref[...] = prod            # write, don't zero-then-add

    @pl.when(k != 0)
    def _():
        acc_ref[...] += prod

    @pl.when(k == pl.num_programs(2) - 1)
    def _():
        out = acc_ref[...] + b_ref[...]
        if relu:
            out = jnp.maximum(out, 0.0)
        o_ref[...] = out.astype(o_ref.dtype)


def _mm_res_kernel(a_ref, w_ref, b_ref, id_ref, o_ref, acc_ref):
    k = pl.program_id(2)
    prod = jnp.dot(a_ref[...], w_ref[...], preferred_element_type=jnp.float32)

    @pl.when(k == 0)
    def _():
        acc_ref[...] = prod

    @pl.when(k != 0)
    def _():
        acc_ref[...] += prod

    @pl.when(k == pl.num_programs(2) - 1)
    def _():
        out = acc_ref[...] + b_ref[...] + id_ref[...].astype(jnp.float32)
        o_ref[...] = jnp.maximum(out, 0.0).astype(o_ref.dtype)


def pallas_matmul(a, w_p, bias_p, n_out, relu=False, residual=None):
    """out = relu?((a @ w) + bias [+ residual]) -> bf16 [M, n_out].

    a:        [M, K]   (cast to bf16)
    w_p:      [Kp, Np] bf16, pre-padded + BN-scale-folded offline
    bias_p:   [1, Np]  f32, pre-padded offline (BN shift folded)
    residual: [M, n_out] bf16 or None (added in f32 before the ReLU)
    """
    M, K = a.shape
    Kp, Np = w_p.shape
    assert K <= Kp and n_out <= Np

    tm = min(_TM, max(_SUB, _round_up(M, _SUB)))
    tn = min(_TN, Np)
    Mp = _round_up(M, tm)

    a_p = a.astype(jnp.bfloat16)
    if (Mp, Kp) != (M, K):
        a_p = jnp.pad(a_p, ((0, Mp - M), (0, Kp - K)))

    r_p = None
    if residual is not None:
        r_p = residual.astype(jnp.bfloat16)
        if r_p.shape != (Mp, Np):
            r_p = jnp.pad(r_p, ((0, Mp - M), (0, Np - n_out)))

    if Kp <= _TK_MAX:
        # ---- single K step: 2-D (parallel, parallel) grid, no scratch ----
        grid = (Mp // tm, Np // tn)
        in_specs = [
            pl.BlockSpec((tm, Kp), lambda i, j: (i, 0)),
            pl.BlockSpec((Kp, tn), lambda i, j: (0, j)),
            pl.BlockSpec((1, tn), lambda i, j: (0, j)),
        ]
        operands = [a_p, w_p, bias_p]
        out_spec = pl.BlockSpec((tm, tn), lambda i, j: (i, j))
        scratch = []
        dims = ("parallel", "parallel")
        if r_p is not None:
            in_specs.append(pl.BlockSpec((tm, tn), lambda i, j: (i, j)))
            operands.append(r_p)
            kernel = _mm_res_kernel_1k
        else:
            kernel = functools.partial(_mm_kernel_1k, relu=relu)
    else:
        # ---- multi-K fallback (never hit for resnet34) ----
        tk = _TK_MAX
        Kp2 = _round_up(Kp, tk)
        a_p = jnp.pad(a_p, ((0, 0), (0, Kp2 - Kp)))
        w2 = jnp.pad(w_p, ((0, Kp2 - Kp), (0, 0)))
        grid = (Mp // tm, Np // tn, Kp2 // tk)
        in_specs = [
            pl.BlockSpec((tm, tk), lambda i, j, k: (i, k)),
            pl.BlockSpec((tk, tn), lambda i, j, k: (k, j)),
            pl.BlockSpec((1, tn), lambda i, j, k: (0, j)),
        ]
        operands = [a_p, w2, bias_p]
        out_spec = pl.BlockSpec((tm, tn), lambda i, j, k: (i, j))
        scratch = [pltpu.VMEM((tm, tn), jnp.float32)]
        dims = ("parallel", "parallel", "arbitrary")
        if r_p is not None:
            in_specs.append(pl.BlockSpec((tm, tn), lambda i, j, k: (i, j)))
            operands.append(r_p)
            kernel = _mm_res_kernel
        else:
            kernel = functools.partial(_mm_kernel, relu=relu)

    out = pl.pallas_call(
        kernel,
        out_shape=jax.ShapeDtypeStruct((Mp, Np), jnp.bfloat16),
        grid_spec=pltpu.PrefetchScalarGridSpec(
            num_scalar_prefetch=0,
            grid=grid,
            in_specs=in_specs,
            out_specs=out_spec,
            scratch_shapes=scratch,
        ),
        compiler_params=pltpu.CompilerParams(
            dimension_semantics=dims,
            vmem_limit_bytes=_VMEM_LIMIT,
        ),
    )(*operands)
    return out[:M, :n_out]


# --------------------------------------------------------------------------
# Conv = NHWC im2col (glue) + Pallas tiled matmul (hot path)
# --------------------------------------------------------------------------


def _im2col_nhwc(x, kh, kw, stride, pad):
    B, H, W, C = x.shape
    x = jnp.pad(x, ((0, 0), (pad, pad), (pad, pad), (0, 0)))
    Hp, Wp = H + 2 * pad, W + 2 * pad
    Ho = (Hp - kh) // stride + 1
    Wo = (Wp - kw) // stride + 1
    cols = []
    for i in range(kh):
        for j in range(kw):
            cols.append(x[:,
                          i:i + (Ho - 1) * stride + 1:stride,
                          j:j + (Wo - 1) * stride + 1:stride, :])
    patches = jnp.concatenate(cols, axis=-1)              # [B, Ho, Wo, kh*kw*C]
    return patches.reshape(B * Ho * Wo, kh * kw * C), Ho, Wo


def conv_bn(x, p, stride, pad, relu, residual=None):
    """x: NHWC bf16; p['w_mat']: [Kp, Np] bf16 (BN folded, padded); p['b']: [1, Np] f32."""
    B = x.shape[0]
    k = p['k']
    patches, Ho, Wo = _im2col_nhwc(x, k, k, stride, pad)
    res2 = None
    if residual is not None:
        # fused residual kernel always applies ReLU (resnet basic block)
        assert relu, "fused residual path always applies ReLU"
        res2 = residual.reshape(B * Ho * Wo, -1)
    out = pallas_matmul(patches, p['w_mat'], p['b'], p['cout'],
                        relu=relu, residual=res2)
    return out.reshape(B, Ho, Wo, p['cout'])


def maxpool3x3s2p1(x):
    # glue: 3x3/stride-2 max-pool (PyTorch resnet stem), NHWC, bf16
    return jax.lax.reduce_window(
        x, jnp.array(-jnp.inf, x.dtype), jax.lax.max,
        window_dimensions=(1, 3, 3, 1),
        window_strides=(1, 2, 2, 1),
        padding=((0, 0), (1, 1), (1, 1), (0, 0)))


# --------------------------------------------------------------------------
# Deterministic parameter construction
# --------------------------------------------------------------------------


class ParamGen:
    def __init__(self, seed):
        self.key = jax.random.PRNGKey(seed)

    def _split(self):
        self.key, sub = jax.random.split(self.key)
        return sub

    def normal(self, shape, scale=1.0):
        return jax.random.normal(self._split(), shape, dtype=jnp.float32) * scale

    def uniform(self, shape):
        return jax.random.uniform(self._split(), shape, dtype=jnp.float32)


def _conv_params(pg, cin, cout, k):
    """Weight + BN folded offline into (bf16 padded matrix, f32 padded bias)."""
    fan_in = cin * k * k
    w = pg.normal((cout, cin, k, k), (2.0 / fan_in) ** 0.5)        # PyTorch OIHW
    # Inference BN fold: scale = gamma/sqrt(var+eps), shift = beta - mean*scale.
    # Synthetic params use identity BN (gamma=1, beta=0, mean=0, var=1).
    gamma, beta, mean, var = 1.0, 0.0, 0.0, 1.0
    scale = gamma / (var + 1e-5) ** 0.5
    # NHWC im2col tap order is (kh, kw, Cin)
    w_mat = w.transpose(2, 3, 1, 0).reshape(k * k * cin, cout) * scale
    bias = jnp.full((cout,), beta - mean * scale, jnp.float32)

    K, N = k * k * cin, cout
    Kp, Np = _round_up(K, _LANE), _round_up(N, _LANE)
    w_mat = jnp.pad(w_mat, ((0, Kp - K), (0, Np - N))).astype(jnp.bfloat16)
    bias_p = jnp.pad(bias, (0, Np - N)).reshape(1, Np)
    return {'w_mat': w_mat, 'b': bias_p, 'k': k, 'cout': cout}


_RESNET34_CFG = [(64, 3, 1), (128, 4, 2), (256, 6, 2), (512, 3, 2)]


def make_resnet34_params(pg, num_classes=58):
    params = {'conv1': _conv_params(pg, 3, 64, 7), 'layers': []}
    cin = 64
    for cout, nblocks, stride in _RESNET34_CFG:
        layer = []
        for bi in range(nblocks):
            s = stride if bi == 0 else 1
            blk = {'conv1': _conv_params(pg, cin, cout, 3),
                   'conv2': _conv_params(pg, cout, cout, 3),
                   'stride': s}
            if s != 1 or cin != cout:
                blk['down'] = _conv_params(pg, cin, cout, 1)
            layer.append(blk)
            cin = cout
        params['layers'].append(layer)
    params['fc_w'] = pg.normal((512, num_classes), (1.0 / 512.0) ** 0.5)
    params['fc_b'] = jnp.zeros((num_classes,), jnp.float32)
    return params


MANO_PARENTS = [-1, 0, 1, 2, 0, 4, 5, 0, 7, 8, 0, 10, 11, 0, 13, 14]
MANO_TIP_IDS = [745, 317, 444, 556, 673]
MANO_REORDER = [0, 13, 14, 15, 16, 1, 2, 3, 17, 4, 5, 6, 18, 10, 11, 12, 19, 7, 8, 9, 20]


def make_mano_params(pg):
    jreg = pg.uniform((16, 778))
    jreg = jreg / jnp.sum(jreg, axis=1, keepdims=True)
    sw = pg.uniform((778, 16))
    sw = sw / jnp.sum(sw, axis=1, keepdims=True)
    return {
        'v_template': pg.normal((778, 3), 0.01),
        'shapedirs_r': pg.normal((778 * 3, 10), 0.01),
        'posedirs_r': pg.normal((778 * 3, 135), 0.001),
        'J_regressor': jreg,
        'weights': sw,
        'hands_mean': pg.normal((45,), 0.1),
    }


# --------------------------------------------------------------------------
# Encoder forward (resnet34, NHWC / bf16 internally)
# --------------------------------------------------------------------------


def resnet34_fwd(x_nchw, params):
    x = jnp.transpose(x_nchw, (0, 2, 3, 1)).astype(jnp.bfloat16)   # NCHW -> NHWC, bf16
    x = conv_bn(x, params['conv1'], stride=2, pad=3, relu=True)
    x = maxpool3x3s2p1(x)
    for layer in params['layers']:
        for blk in layer:
            s = blk['stride']
            out = conv_bn(x, blk['conv1'], stride=s, pad=1, relu=True)
            if 'down' in blk:
                identity = conv_bn(x, blk['down'], stride=s, pad=0, relu=False)
            else:
                identity = x
            # conv2 + BN + residual add + ReLU fused in one Pallas kernel
            x = conv_bn(out, blk['conv2'], stride=1, pad=1, relu=True,
                        residual=identity)
    feat = jnp.mean(x.astype(jnp.float32), axis=(1, 2))             # global avg pool, f32
    # tiny FC head ([B,512]@[512,58]) left to XLA per perf review
    return jnp.dot(feat, params['fc_w']) + params['fc_b']


# --------------------------------------------------------------------------
# Decoder forward (ManoLayer, use_pca=False, ncomps=45, flat_hand_mean=False)
# Kept in f32 XLA ops: these matmuls are tiny and latency-dominated in Pallas.
# --------------------------------------------------------------------------


def _rodrigues(axisang):
    # axisang: [N, 3] -> [N, 3, 3]
    angle = jnp.sqrt(jnp.sum(axisang * axisang, axis=1, keepdims=True) + 1e-8)
    axis = axisang / angle
    c = jnp.cos(angle)[:, :, None]
    s = jnp.sin(angle)[:, :, None]
    x, y, z = axis[:, 0], axis[:, 1], axis[:, 2]
    zeros = jnp.zeros_like(x)
    K = jnp.stack([zeros, -z, y, z, zeros, -x, -y, x, zeros], axis=1).reshape(-1, 3, 3)
    eye = jnp.eye(3, dtype=jnp.float32)[None]
    outer = axis[:, :, None] * axis[:, None, :]
    return c * eye + s * K + (1.0 - c) * outer


def _global_rigid_transform(rot_mats, joints):
    # rot_mats: [B,16,3,3], joints: [B,16,3]
    B = rot_mats.shape[0]

    def make_T(R, t):
        top = jnp.concatenate([R, t[:, :, None]], axis=2)                    # [B,3,4]
        bot = jnp.broadcast_to(jnp.array([[[0., 0., 0., 1.]]], jnp.float32), (B, 1, 4))
        return jnp.concatenate([top, bot], axis=1)                           # [B,4,4]

    results = [make_T(rot_mats[:, 0], joints[:, 0])]
    for i in range(1, 16):
        p = MANO_PARENTS[i]
        rel = joints[:, i] - joints[:, p]
        T_i = make_T(rot_mats[:, i], rel)
        results.append(jnp.einsum('bij,bjk->bik', results[p], T_i))
    results = jnp.stack(results, axis=1)                                     # [B,16,4,4]
    posed_joints = results[:, :, :3, 3]                                      # [B,16,3]
    joints_h = jnp.concatenate([joints, jnp.zeros((B, 16, 1), jnp.float32)], axis=2)
    init = jnp.einsum('bjik,bjk->bji', results, joints_h)                    # [B,16,4]
    rel_tf = results - jnp.concatenate(
        [jnp.zeros((B, 16, 4, 3), jnp.float32), init[..., None]], axis=3)    # [B,16,4,4]
    return posed_joints, rel_tf


def mano_fwd(pose_coeffs, betas, mp):
    pose_coeffs = pose_coeffs.astype(jnp.float32)
    betas = betas.astype(jnp.float32)
    B = pose_coeffs.shape[0]
    root = pose_coeffs[:, :3]
    hand = pose_coeffs[:, 3:48] + mp['hands_mean'][None, :]   # flat_hand_mean=False
    full_pose = jnp.concatenate([root, hand], axis=1)         # [B, 48]
    rot_mats = _rodrigues(full_pose.reshape(B * 16, 3)).reshape(B, 16, 3, 3)
    pose_map = (rot_mats[:, 1:] - jnp.eye(3, dtype=jnp.float32)).reshape(B, 135)

    # shape blend shapes
    v_shaped = jnp.dot(betas, mp['shapedirs_r'].T).reshape(B, 778, 3) \
        + mp['v_template'][None]
    # joint regression
    joints = jnp.einsum('jv,bvc->bjc', mp['J_regressor'], v_shaped)          # [B,16,3]
    # pose blend shapes
    v_posed = v_shaped + jnp.dot(pose_map, mp['posedirs_r'].T).reshape(B, 778, 3)

    posed_joints, A = _global_rigid_transform(rot_mats, joints)

    # linear blend skinning: per-vertex transform = skin_weights @ A
    T = jnp.einsum('vj,bjpq->bvpq', mp['weights'], A)                        # [B,778,4,4]
    v_posed_h = jnp.concatenate([v_posed, jnp.ones((B, 778, 1), jnp.float32)], axis=2)
    verts = jnp.einsum('bvij,bvj->bvi', T, v_posed_h)[..., :3]

    tips = verts[:, jnp.array(MANO_TIP_IDS)]
    jtr = jnp.concatenate([posed_joints, tips], axis=1)
    jtr = jtr[:, jnp.array(MANO_REORDER)]
    # th_trans defaults to zeros, center_idx=None -> no recentering; scale to mm
    return verts * 1000.0, jtr * 1000.0


# --------------------------------------------------------------------------
# AE forward
# --------------------------------------------------------------------------


def ae_forward(x, resnet_params, mano_params):
    encoded = resnet34_fwd(x, resnet_params)          # [B, 58]
    pose, betas = encoded[:, :48], encoded[:, 48:58]  # torch.split(encoded, [48, 10], -1)
    decoded = mano_fwd(pose, betas, mano_params)      # (verts, joints)
    return decoded[1]                                 # joints: [B, 21, 3]


# --------------------------------------------------------------------------
# main
# --------------------------------------------------------------------------

if __name__ == "__main__":
    pg = ParamGen(42)
    resnet_params = make_resnet34_params(pg, num_classes=58)
    mano_params = make_mano_params(pg)

    x = jax.random.normal(jax.random.PRNGKey(0), (2, 3, 16, 16), dtype=jnp.float32)

    joints = ae_forward(x, resnet_params, mano_params)
    joints = jax.block_until_ready(joints)

    assert joints.shape == (2, 21, 3), joints.shape
    assert bool(jnp.all(jnp.isfinite(joints)))
    print("KERNEL_OK")
</pallas_src>

<mosaic_0001>
module attributes {stable_mosaic.version = 11 : i64} {
  func.func @_mm_kernel_1k(%arg0: i32, %arg1: i32, %arg2: memref<128x256xbf16, #tpu.memory_space<vmem>>, %arg3: memref<256x128xbf16, #tpu.memory_space<vmem>>, %arg4: memref<1x128xf32, #tpu.memory_space<vmem>>, %arg5: memref<128x128xbf16, #tpu.memory_space<vmem>>) attributes {dimension_semantics = [#tpu.dimension_semantics<parallel>, #tpu.dimension_semantics<parallel>], iteration_bounds = array<i64: 1, 1>, scalar_prefetch = 0 : i64, scratch_operands = 0 : i64, tpu.core_type = #tpu.core_type<tc>, window_params = [{transform_indices = @transform_0, window_bounds = array<i64: 128, 256>}, {transform_indices = @transform_1, window_bounds = array<i64: 256, 128>}, {transform_indices = @transform_2, window_bounds = array<i64: 1, 128>}, {transform_indices = @transform_3, window_bounds = array<i64: 128, 128>}]} {
    %c0 = arith.constant 0 : index
    %c0_0 = arith.constant 0 : index
    %0 = vector.load %arg2[%c0, %c0_0] : memref<128x256xbf16, #tpu.memory_space<vmem>>, vector<128x256xbf16>
    %c0_1 = arith.constant 0 : index
    %c0_2 = arith.constant 0 : index
    %1 = vector.load %arg3[%c0_1, %c0_2] : memref<256x128xbf16, #tpu.memory_space<vmem>>, vector<256x128xbf16>
    %cst = arith.constant dense<0.000000e+00> : vector<128x128xf32>
    %2 = tpu.matmul %0, %1, %cst {dimension_numbers = #tpu.dot_dimension_numbers<[1], [0], [0], [1], [0, 0, 1, 1], [], []>} : vector<128x256xbf16>, vector<256x128xbf16>, vector<128x128xf32> -> vector<128x128xf32>
    %c0_3 = arith.constant 0 : index
    %c0_4 = arith.constant 0 : index
    %3 = vector.load %arg4[%c0_3, %c0_4] : memref<1x128xf32, #tpu.memory_space<vmem>>, vector<1x128xf32>
    %4 = vector.broadcast %3 : vector<1x128xf32> to vector<128x128xf32>
    %5 = arith.addf %2, %4 : vector<128x128xf32>
    %cst_5 = arith.constant 0.000000e+00 : f32
    %6 = vector.broadcast %cst_5 : f32 to vector<128x128xf32>
    %7 = arith.maximumf %5, %6 : vector<128x128xf32>
    %8 = arith.truncf %7 : vector<128x128xf32> to vector<128x128xbf16>
    %c0_6 = arith.constant 0 : index
    %c0_7 = arith.constant 0 : index
    %9 = vector.load %arg5[%c0_6, %c0_7] : memref<128x128xbf16, #tpu.memory_space<vmem>>, vector<128x128xbf16>
    tpu.vector_store %arg5[%c0_6, %c0_7], %8 {strides = array<i32>} : memref<128x128xbf16, #tpu.memory_space<vmem>>, vector<128x128xbf16>,
    return
  }
  func.func @transform_0(%arg0: i32, %arg1: i32) -> (i32, i32) {
    %c0_i32 = arith.constant 0 : i32
    %c0_i32_0 = arith.constant 0 : i32
    return %arg0, %c0_i32 : i32, i32
  }
  func.func @transform_1(%arg0: i32, %arg1: i32) -> (i32, i32) {
    %c0_i32 = arith.constant 0 : i32
    %c0_i32_0 = arith.constant 0 : i32
    return %c0_i32, %arg1 : i32, i32
  }
  func.func @transform_2(%arg0: i32, %arg1: i32) -> (i32, i32) {
    %c0_i32 = arith.constant 0 : i32
    %c0_i32_0 = arith.constant 0 : i32
    return %c0_i32, %arg1 : i32, i32
  }
  func.func @transform_3(%arg0: i32, %arg1: i32) -> (i32, i32) {
    %c0_i32 = arith.constant 0 : i32
    return %arg0, %arg1 : i32, i32
  }
}

</mosaic_0001>

<bundles_post_ra>
// kernel: tpu_custom_call.1
= control target key start
LH: loop header
LB: loop body
LE: loop exit
PB: predicated region body
PF: predicated region fallthrough
CT: control target
= control target key end

     0   :  { %8 = vsyncpa [#allocation3], 0  ;;  %s813_s0 = inlined_call_operand.hbm [shape: bf16[128,256], index: 0, kind: input, shape index: {}]   ;;  %s814_s1 = inlined_call_operand.hbm [shape: bf16[256,128], index: 1, kind: input, shape index: {}]   ;;  %s815_s2 = inlined_call_operand.vmem [shape: f32[1,128], index: 2, kind: input, shape index: {}]   ;;  %s816_s3 = inlined_call_operand.hbm [shape: bf16[128,128], index: 3, kind: output, shape index: {}]  }
   0x1   :  { %9 = vsyncpa [#allocation6], 0 }
   0x2   :  { %10 = vsyncpa [#allocation4], 0  ;;  %s15_s14 = sshll.u32 %s813_s0, 4  ;;  %s750_s15 = smov [#allocation2]   ;;  %s16_s14 = int_to_ptr.hbm [resolvable:$true] %s15_s14 }
   0x3   :  { %s17_s16 = sshll.u32 %s750_s15, 4  ;;  %s28_s19 = sshll.u32 %s814_s1, 4  ;;  %s18_s16 = int_to_ptr.vmem [resolvable:$true] %s17_s16  ;;  %s29_s19 = int_to_ptr.hbm [resolvable:$true] %s28_s19 }
   0x4   :  { %s751_s20 = smov 128   ;;  %s752_s21 = smov 8  }
   0x5   :  { %23 = dma.hbm_to_vmem [thread:$0]  %s16_s14, 2048, %s18_s16, [#allocation3], %s751_s20, %s751_s20, %s752_s21  }
   0x6   :  { %s753_s22 = smov [#allocation5]   ;;  %s754_s24 = smov 64  }
   0x7   :  { %s30_s23 = sshll.u32 %s753_s22, 4  ;;  %s755_s25 = smov 4   ;;  %s31_s23 = int_to_ptr.vmem [resolvable:$true] %s30_s23 }
   0x8   :  { %36 = dma.hbm_to_vmem [thread:$0]  %s29_s19, 2048, %s31_s23, [#allocation6], %s754_s24, %s754_s24, %s755_s25  }
   0x9   :  { %744 = dma.done.wait [#allocation3], 2048  }
   0xa   :  { %745 = vsyncadd [#allocation3], 4294965248 }
   0xb   :  { %746 = dma.done.wait [#allocation6], 2048  }
   0xc   :  { %747 = vsyncadd [#allocation6], 4294965248  ;;  %v592_v0 = vld [vmem:[#allocation5 + $0x38] sm:$0xff]  ;;  %v591_v2 = vld [vmem:[#allocation5 + $0x30] sm:$0xff]  ;;  %s427_s29 = sshll.u32 %s816_s3, 4  ;;  %s428_s29 = int_to_ptr.hbm [resolvable:$true] %s427_s29 }
   0xd   :  { %v600_v1 = vld [vmem:[#allocation5 + $0x78] sm:$0xff]  ;;  %275 = vmatpush.bf16.msra.mxu0 %v592_v0  ;;  %648 = vmatpush.bf16.msra.mxu2 %v592_v0  ;;  %v599_v3 = vld [vmem:[#allocation5 + $0x70] sm:$0xff]  ;;  %v590_v4 = vld [vmem:[#allocation5 + $0x28] sm:$0xff] }
   0xe   :  { %324 = vmatpush.bf16.msra.mxu1 %v600_v1  ;;  %656 = vmatpush.bf16.msra.mxu3 %v600_v1  ;;  %v598_v5 = vld [vmem:[#allocation5 + $0x68] sm:$0xff]  ;;  %v589_v6 = vld [vmem:[#allocation5 + $0x20] sm:$0xff]  ;;  %v588_v8 = vld [vmem:[#allocation5 + $0x18] sm:$0xff] }
   0xf   :  { %v597_v7 = vld [vmem:[#allocation5 + $0x60] sm:$0xff]  ;;  %v596_v9 = vld [vmem:[#allocation5 + $0x58] sm:$0xff]  ;;  %v587_v10 = vld [vmem:[#allocation5 + $0x10] sm:$0xff] }
  0x10   :  { %v595_v11 = vld [vmem:[#allocation5 + $0x50] sm:$0xff]  ;;  %v586_v12 = vld [vmem:[#allocation5 + $0x8] sm:$0xff]  ;;  %v585_v14 = vld [vmem:[#allocation5] sm:$0xff] }
  0x11   :  { %276 = vmatpush.bf16.msra.mxu0 %v591_v2  ;;  %649 = vmatpush.bf16.msra.mxu2 %v591_v2  ;;  %v594_v13 = vld [vmem:[#allocation5 + $0x48] sm:$0xff]  ;;  %v593_v15 = vld [vmem:[#allocation5 + $0x40] sm:$0xff]  ;;  %v451_v28 = vld [vmem:[#allocation2 + $0x10] sm:$0xf] }
  0x12   :  { %325 = vmatpush.bf16.msra.mxu1 %v599_v3  ;;  %657 = vmatpush.bf16.msra.mxu3 %v599_v3  ;;  %v443_v16 = vld [vmem:[#allocation2] sm:$0xf]  ;;  %v570_v17 = vld [vmem:[#allocation2 + $0x4] sm:$0xf0]  ;;  %v569_v20 = vld [vmem:[#allocation2 + $0x4] sm:$0xf] }
  0x13   :  { %v475_v18 = vld [vmem:[#allocation2 + $0x40] sm:$0xf]  ;;  %v578_v19 = vld [vmem:[#allocation2 + $0x44] sm:$0xf0]  ;;  %v445_v21 = vld [vmem:[#allocation2 + $0x8] sm:$0xf0]  ;;  %v444_v24 = vor.u32 %v570_v17, %v443_v16 }
  0x14   :  { %v577_v22 = vld [vmem:[#allocation2 + $0x44] sm:$0xf]  ;;  %v477_v23 = vld [vmem:[#allocation2 + $0x48] sm:$0xf0]  ;;  %v476_v25 = vor.u32 %v578_v19, %v475_v18  ;;  %v448_v26 = vor.u32 %v569_v20, %v445_v21  ;;  %v572_v29 = vld [vmem:[#allocation2 + $0x14] sm:$0xf0] }
  0x15   :  { %277 = vmatpush.bf16.msra.mxu0 %v590_v4  ;;  %650 = vmatpush.bf16.msra.mxu2 %v590_v4  ;;  %v480_v27 = vor.u32 %v577_v22, %v477_v23  ;;  %v483_v30 = vld [vmem:[#allocation2 + $0x50] sm:$0xf]  ;;  %v580_v31 = vld [vmem:[#allocation2 + $0x54] sm:$0xf0]  ;;  %v571_v32 = vld [vmem:[#allocation2 + $0x14] sm:$0xf]  ;;  %v452_v36 = vor.u32 %v572_v29, %v451_v28 }
  0x16   :  { %326 = vmatpush.bf16.msra.mxu1 %v598_v5  ;;  %658 = vmatpush.bf16.msra.mxu3 %v598_v5  ;;  %v453_v33 = vld [vmem:[#allocation2 + $0x18] sm:$0xf0]  ;;  %v579_v34 = vld [vmem:[#allocation2 + $0x54] sm:$0xf]  ;;  %v484_v37 = vor.u32 %v580_v31, %v483_v30  ;;  %v459_v40 = vld [vmem:[#allocation2 + $0x20] sm:$0xf] }
  0x17   :  { %v485_v35 = vld [vmem:[#allocation2 + $0x58] sm:$0xf0]  ;;  %v456_v38 = vor.u32 %v571_v32, %v453_v33  ;;  %v574_v41 = vld [vmem:[#allocation2 + $0x24] sm:$0xf0]  ;;  %v491_v42 = vld [vmem:[#allocation2 + $0x60] sm:$0xf] }
  0x18   :  { %v488_v39 = vor.u32 %v579_v34, %v485_v35  ;;  %v582_v43 = vld [vmem:[#allocation2 + $0x64] sm:$0xf0]  ;;  %v573_v44 = vld [vmem:[#allocation2 + $0x24] sm:$0xf]  ;;  %v461_v45 = vld [vmem:[#allocation2 + $0x28] sm:$0xf0]  ;;  %v460_v48 = vor.u32 %v574_v41, %v459_v40 }
  0x19   :  { %278 = vmatpush.bf16.msra.mxu0 %v589_v6  ;;  %651 = vmatpush.bf16.msra.mxu2 %v589_v6  ;;  %v581_v46 = vld [vmem:[#allocation2 + $0x64] sm:$0xf]  ;;  %v493_v47 = vld [vmem:[#allocation2 + $0x68] sm:$0xf0]  ;;  %v492_v49 = vor.u32 %v582_v43, %v491_v42  ;;  %v464_v50 = vor.u32 %v573_v44, %v461_v45  ;;  %v467_v52 = vld [vmem:[#allocation2 + $0x30] sm:$0xf] }
  0x1a   :  { %327 = vmatpush.bf16.msra.mxu1 %v597_v7  ;;  %659 = vmatpush.bf16.msra.mxu3 %v597_v7  ;;  %v496_v51 = vor.u32 %v581_v46, %v493_v47  ;;  %v576_v53 = vld [vmem:[#allocation2 + $0x34] sm:$0xf0]  ;;  %v499_v54 = vld [vmem:[#allocation2 + $0x70] sm:$0xf]  ;;  %v575_v56 = vld [vmem:[#allocation2 + $0x34] sm:$0xf] }
  0x1b   :  { %v584_v55 = vld [vmem:[#allocation2 + $0x74] sm:$0xf0]  ;;  %v469_v57 = vld [vmem:[#allocation2 + $0x38] sm:$0xf0]  ;;  %v583_v58 = vld [vmem:[#allocation2 + $0x74] sm:$0xf]  ;;  %v468_v60 = vor.u32 %v576_v53, %v467_v52 }
  0x1c   :  { %v501_v59 = vld [vmem:[#allocation2 + $0x78] sm:$0xf0]  ;;  %v500_v61 = vor.u32 %v584_v55, %v499_v54  ;;  %v472_v62 = vor.u32 %v575_v56, %v469_v57  ;;  %v789_v1 = vld [vmem:[%s815_s2] ss:$0 sm:$0xff]  ;;  %s756_s2 = smov [#allocation7]  }
  0x1d   :  { %279 = vmatpush.bf16.msra.mxu0 %v588_v8  ;;  %652 = vmatpush.bf16.msra.mxu2 %v588_v8  ;;  %v504_v63 = vor.u32 %v583_v58, %v501_v59  ;;  %s425_s26 = sshll.u32 %s756_s2, 4  ;;  %s426_s26 = int_to_ptr.vmem [resolvable:$true] %s425_s26 }
  0x1e   :  { %328 = vmatpush.bf16.msra.mxu1 %v596_v9  ;;  %660 = vmatpush.bf16.msra.mxu3 %v596_v9 }
  0x21   :  { %280 = vmatpush.bf16.msra.mxu0 %v587_v10  ;;  %653 = vmatpush.bf16.msra.mxu2 %v587_v10 }
  0x22   :  { %329 = vmatpush.bf16.msra.mxu1 %v595_v11  ;;  %661 = vmatpush.bf16.msra.mxu3 %v595_v11 }
  0x25   :  { %281 = vmatpush.bf16.msra.mxu0 %v586_v12  ;;  %654 = vmatpush.bf16.msra.mxu2 %v586_v12 }
  0x26   :  { %330 = vmatpush.bf16.msra.mxu1 %v594_v13  ;;  %662 = vmatpush.bf16.msra.mxu3 %v594_v13 }
  0x29   :  { %282 = vmatpush.bf16.msra.mxu0 %v585_v14  ;;  %655 = vmatpush.bf16.msra.mxu2 %v585_v14 }
  0x2a   :  { %331 = vmatpush.bf16.msra.mxu1 %v593_v15  ;;  %663 = vmatpush.bf16.msra.mxu3 %v593_v15 }
  0x2c   :  { %283 = vmatmul.bf16.vlgmr.msra.gmra.mxu0 %v444_v24  ;;  %303 = vmatmul.bf16.vlgmr.msra.gmra.mxu2 %v476_v25 }
  0x2d   :  { %332 = vmatmul.bf16.vlgmr.msra.gmra.mxu1 %v448_v26  ;;  %352 = vmatmul.bf16.vlgmr.msra.gmra.mxu3 %v480_v27 }
  0x3c   :  { %288 = vmatmul.bf16.gmra.mxu0 %v452_v36  ;;  %308 = vmatmul.bf16.gmra.mxu2 %v484_v37 }
  0x3d   :  { %337 = vmatmul.bf16.gmra.mxu1 %v456_v38  ;;  %357 = vmatmul.bf16.gmra.mxu3 %v488_v39 }
  0x4c   :  { %293 = vmatmul.bf16.gmra.mxu0 %v460_v48  ;;  %313 = vmatmul.bf16.gmra.mxu2 %v492_v49 }
  0x4d   :  { %342 = vmatmul.bf16.gmra.mxu1 %v464_v50  ;;  %362 = vmatmul.bf16.gmra.mxu3 %v496_v51 }
  0x5c   :  { %298 = vmatmul.bf16.gmra.mxu0 %v468_v60  ;;  %318 = vmatmul.bf16.gmra.mxu2 %v500_v61 }
  0x5d   :  { %347 = vmatmul.bf16.gmra.mxu1 %v472_v62  ;;  %367 = vmatmul.bf16.gmra.mxu3 %v504_v63 }
  0xa9   :  { %v284_v0 = vpop.f32.mrf.mxu0 }
  0xaa   :  { %v333_v2 = vpop.f32.mrf.mxu1  ;;  %v285_v3 = vadd.f32 %v789_v1, %v284_v0 }
  0xac   :  { %v334_v7 = vadd.f32 %v333_v2, %v285_v3 }
  0xae   :  { %v373_v12 = vmax.f32 %v334_v7, 0.0 }
  0xaf   :  { %v304_v4 = vpop.f32.mrf.mxu2 }
  0xb0   :  { %v353_v5 = vpop.f32.mrf.mxu3  ;;  %v305_v10 = vadd.f32 %v789_v1, %v304_v4 }
  0xb1   :  { %v286_v6 = vpop.f32.mrf.mxu0 }
  0xb2   :  { %v287_v8 = vadd.f32 %v789_v1, %v286_v6  ;;  %v335_v9 = vpop.f32.mrf.mxu1  ;;  %v354_v15 = vadd.f32 %v353_v5, %v305_v10 }
  0xb4   :  { %v336_v11 = vadd.f32 %v335_v9, %v287_v8  ;;  %v381_v22 = vmax.f32 %v354_v15, 0.0 }
  0xb6   :  { %v374_v13 = vmax.f32 %v336_v11, 0.0 }
  0xb7   :  { %v306_v14 = vpop.f32.mrf.mxu2 }
  0xb8   :  { %v604_v16 = vpack.c.bf16 %v374_v13, %v373_v12  ;;  %v307_v17 = vadd.f32 %v789_v1, %v306_v14  ;;  %v355_v18 = vpop.f32.mrf.mxu3 }
  0xb9   :  { %v289_v19 = vpop.f32.mrf.mxu0 }
  0xba   :  { %605 = vst [vmem:[#allocation7] sm:$0xff] %v604_v16   ;;  %v356_v20 = vadd.f32 %v355_v18, %v307_v17  ;;  %v338_v21 = vpop.f32.mrf.mxu1  ;;  %v290_v25 = vadd.f32 %v789_v1, %v289_v19 }
  0xbc   :  { %v382_v23 = vmax.f32 %v356_v20, 0.0  ;;  %v339_v29 = vadd.f32 %v338_v21, %v290_v25 }
  0xbe   :  { %v624_v24 = vpack.c.bf16 %v382_v23, %v381_v22  ;;  %v375_v34 = vmax.f32 %v339_v29, 0.0 }
  0xbf   :  { %v309_v26 = vpop.f32.mrf.mxu2 }
  0xc0   :  { %644 = vst [vmem:[#allocation7 + $0x20] sm:$0xff] %v624_v24   ;;  %v358_v27 = vpop.f32.mrf.mxu3  ;;  %v310_v32 = vadd.f32 %v789_v1, %v309_v26 }
  0xc1   :  { %v291_v28 = vpop.f32.mrf.mxu0 }
  0xc2   :  { %v292_v30 = vadd.f32 %v789_v1, %v291_v28  ;;  %v340_v31 = vpop.f32.mrf.mxu1  ;;  %v359_v37 = vadd.f32 %v358_v27, %v310_v32 }
  0xc4   :  { %v341_v33 = vadd.f32 %v340_v31, %v292_v30  ;;  %v383_v44 = vmax.f32 %v359_v37, 0.0 }
  0xc6   :  { %v376_v35 = vmax.f32 %v341_v33, 0.0 }
  0xc7   :  { %v311_v36 = vpop.f32.mrf.mxu2 }
  0xc8   :  { %v609_v38 = vpack.c.bf16 %v376_v35, %v375_v34  ;;  %v312_v39 = vadd.f32 %v789_v1, %v311_v36  ;;  %v360_v40 = vpop.f32.mrf.mxu3 }
  0xc9   :  { %v294_v41 = vpop.f32.mrf.mxu0 }
  0xca   :  { %641 = vst [vmem:[#allocation7 + $0x8] sm:$0xff] %v609_v38   ;;  %v361_v42 = vadd.f32 %v360_v40, %v312_v39  ;;  %v343_v43 = vpop.f32.mrf.mxu1  ;;  %v295_v47 = vadd.f32 %v789_v1, %v294_v41 }
  0xcc   :  { %v384_v45 = vmax.f32 %v361_v42, 0.0  ;;  %v344_v51 = vadd.f32 %v343_v43, %v295_v47 }
  0xce   :  { %v629_v46 = vpack.c.bf16 %v384_v45, %v383_v44  ;;  %v377_v56 = vmax.f32 %v344_v51, 0.0 }
  0xcf   :  { %v314_v48 = vpop.f32.mrf.mxu2 }
  0xd0   :  { %645 = vst [vmem:[#allocation7 + $0x28] sm:$0xff] %v629_v46   ;;  %v363_v49 = vpop.f32.mrf.mxu3  ;;  %v315_v54 = vadd.f32 %v789_v1, %v314_v48 }
  0xd1   :  { %v296_v50 = vpop.f32.mrf.mxu0 }
  0xd2   :  { %v297_v52 = vadd.f32 %v789_v1, %v296_v50  ;;  %v345_v53 = vpop.f32.mrf.mxu1  ;;  %v364_v59 = vadd.f32 %v363_v49, %v315_v54 }
  0xd4   :  { %v346_v55 = vadd.f32 %v345_v53, %v297_v52  ;;  %v385_v3 = vmax.f32 %v364_v59, 0.0 }
  0xd6   :  { %v378_v57 = vmax.f32 %v346_v55, 0.0 }
  0xd7   :  { %v316_v58 = vpop.f32.mrf.mxu2 }
  0xd8   :  { %v614_v60 = vpack.c.bf16 %v378_v57, %v377_v56  ;;  %v317_v61 = vadd.f32 %v789_v1, %v316_v58  ;;  %v365_v62 = vpop.f32.mrf.mxu3 }
  0xd9   :  { %v299_v63 = vpop.f32.mrf.mxu0 }
  0xda   :  { %642 = vst [vmem:[#allocation7 + $0x10] sm:$0xff] %v614_v60   ;;  %v366_v0 = vadd.f32 %v365_v62, %v317_v61  ;;  %v348_v2 = vpop.f32.mrf.mxu1  ;;  %v300_v6 = vadd.f32 %v789_v1, %v299_v63 }
  0xdc   :  { %v386_v4 = vmax.f32 %v366_v0, 0.0  ;;  %v349_v10 = vadd.f32 %v348_v2, %v300_v6 }
  0xde   :  { %v634_v5 = vpack.c.bf16 %v386_v4, %v385_v3  ;;  %v379_v15 = vmax.f32 %v349_v10, 0.0 }
  0xdf   :  { %v319_v7 = vpop.f32.mrf.mxu2 }
  0xe0   :  { %646 = vst [vmem:[#allocation7 + $0x30] sm:$0xff] %v634_v5   ;;  %v368_v8 = vpop.f32.mrf.mxu3  ;;  %v320_v13 = vadd.f32 %v789_v1, %v319_v7 }
  0xe1   :  { %v301_v9 = vpop.f32.mrf.mxu0 }
  0xe2   :  { %v302_v11 = vadd.f32 %v789_v1, %v301_v9  ;;  %v350_v12 = vpop.f32.mrf.mxu1  ;;  %v369_v18 = vadd.f32 %v368_v8, %v320_v13 }
  0xe4   :  { %v351_v14 = vadd.f32 %v350_v12, %v302_v11  ;;  %v387_v23 = vmax.f32 %v369_v18, 0.0 }
  0xe6   :  { %v380_v16 = vmax.f32 %v351_v14, 0.0 }
  0xe7   :  { %v321_v17 = vpop.f32.mrf.mxu2 }
  0xe8   :  { %v619_v19 = vpack.c.bf16 %v380_v16, %v379_v15  ;;  %v322_v20 = vadd.f32 %v789_v1, %v321_v17  ;;  %v370_v21 = vpop.f32.mrf.mxu3 }
  0xea   :  { %643 = vst [vmem:[#allocation7 + $0x18] sm:$0xff] %v619_v19   ;;  %v371_v22 = vadd.f32 %v370_v21, %v322_v20 }
  0xec   :  { %v388_v24 = vmax.f32 %v371_v22, 0.0 }
  0xee   :  { %v639_v25 = vpack.c.bf16 %v388_v24, %v387_v23 }
  0xf0   :  { %647 = vst [vmem:[#allocation7 + $0x38] sm:$0xff] %v639_v25  }
  0xf1   :  { %433 = dma.vmem_to_hbm [thread:$0]  %s426_s26, 1024, %s428_s29, [#allocation4], %s754_s24, %s754_s24, %s755_s25  }
  0xf2   :  { %748 = dma.done.wait [#allocation4], 1024  }
  0xf3   :  { %749 = vsyncadd [#allocation4], 4294966272 }
  0xf4   :  { %438 = vsyncpa [#allocation3], 1 }
  0xf5   :  { %439 = vsyncpa [#allocation6], 1 }
  0xf6   :  { %440 = vsyncpa [#allocation4], 1 }

</bundles_post_ra>
